<compile_context>
chip_gen: v7x
topology: tpu7x:2x2x1
jax: 0.10.0
libtpu: 0.0.40
codegen_flags: <defaults>
</compile_context>

<pallas_src>
import functools

import jax
import jax.numpy as jnp
from jax.experimental import pallas as pl
from jax.experimental.pallas import tpu as pltpu


_NSEM = 32                       # DMA sems shared round-robin over in-flight rows
_MAX_TILE_ROWS = 128             # rows per grid step (bounds static unroll of DMA issue)
_TARGET_TILE_BYTES = 4 << 20     # aim for ~4 MiB tiles (amortize grid-step overhead)
_FULL_TILE_HARD_CAP = 12 << 20   # absolute cap when S has no multiple-of-8 divisor


def _vmem_capacity_bytes():
    try:
        return int(pltpu.get_tpu_info().vmem_capacity_bytes)
    except Exception:
        return 64 << 20          # conservative fallback (v7x per-TensorCore VMEM)


# ---------------------------------------------------------------------------
# Kernels
# ---------------------------------------------------------------------------

def _resident_kernel(S, ids_ref, table_ref, pos_ref, out_ref):
    """Table fully resident in VMEM; gather rows with dynamic vector loads.

    ids_ref:   (B*S,)     int32 in SMEM (flat)
    table_ref: (V, D)     VMEM-resident table (constant block index -> one DMA)
    pos_ref:   (1, tS, D) positional tile
    out_ref:   (1, tS, D) output tile
    """
    si = pl.program_id(0)
    b = pl.program_id(1)
    tS = out_ref.shape[1]
    base = b * S + si * tS
    for t in range(tS):                               # static unroll
        row = ids_ref[base + t]                       # scalar read from SMEM
        vals = table_ref[pl.ds(row, 1), :]            # (1, D) dynamic row load
        out_ref[0, pl.ds(t, 1), :] = (
            vals + pos_ref[0, pl.ds(t, 1), :]).astype(out_ref.dtype)


def _gather_kernel_direct(S, ids_ref, table_hbm, pos_ref, out_ref, sems):
    """Table in HBM; rows DMA'd directly into the output tile (no scratch)."""
    si = pl.program_id(0)
    b = pl.program_id(1)
    tS = out_ref.shape[1]
    base = b * S + si * tS
    n_sem = sems.shape[0]

    # Read every id BEFORE any wait, build descriptors from the real rows,
    # start ALL copies, then wait all: max bytes in flight, no SMEM
    # sst->sld-forwarding break, no per-row latency exposure.
    rows = [ids_ref[base + t] for t in range(tS)]
    copies = [pltpu.make_async_copy(table_hbm.at[rows[t]], out_ref.at[0, t],
                                    sems.at[t % n_sem])
              for t in range(tS)]
    for c in copies:
        c.start()
    for c in copies:
        c.wait()

    # Single vectorized, lane-dense add + store of the whole tile.
    out_ref[0] = (out_ref[0] + pos_ref[0]).astype(out_ref.dtype)


def _gather_kernel_scratch(S, ids_ref, table_hbm, pos_ref, out_ref, gbuf, sems):
    """Same as above but via a VMEM scratch (used when out dtype != table dtype)."""
    si = pl.program_id(0)
    b = pl.program_id(1)
    tS = out_ref.shape[1]
    base = b * S + si * tS
    n_sem = sems.shape[0]

    rows = [ids_ref[base + t] for t in range(tS)]
    copies = [pltpu.make_async_copy(table_hbm.at[rows[t]], gbuf.at[t],
                                    sems.at[t % n_sem])
              for t in range(tS)]
    for c in copies:
        c.start()
    for c in copies:
        c.wait()

    out_ref[0] = (gbuf[...] + pos_ref[0]).astype(out_ref.dtype)


# ---------------------------------------------------------------------------
# Wrapper
# ---------------------------------------------------------------------------

def _choose_seq_tile(S, D, itemsize):
    """Largest usable seq tile: multiple of 8 (or == S), <= caps, divides S."""
    row_bytes = max(1, D * itemsize)
    cap = int(min(_MAX_TILE_ROWS, max(8, _TARGET_TILE_BYTES // row_bytes)))
    if S <= cap:
        return S                                  # full dim always legal
    best = None
    for t in range(8, cap + 1, 8):
        if S % t == 0:
            best = t
    if best is not None:
        return best
    if S * row_bytes <= _FULL_TILE_HARD_CAP:
        return S                                  # no nice divisor; full-S tile still fits
    raise ValueError(
        f"Cannot tile sequence length {S} (row bytes {row_bytes}): no multiple-of-8 "
        f"divisor <= {cap} and a full-sequence tile exceeds {_FULL_TILE_HARD_CAP} "
        f"bytes. Pad the sequence length to a multiple of 8.")


def embedding_semantic_norm_fwd(token_ids, token_emb_table, pos_emb, *,
                                out_dtype=None, force_gather=False):
    """Eval-mode forward of EmbeddingSemanticNorm.

    token_ids:       int32   [B, S]
    token_emb_table: float   [V, D]
    pos_emb:         float   [1, max_seq_len, D]
    returns:         [B, S, D]
    """
    B, S = token_ids.shape
    V, D = token_emb_table.shape
    tbl_dtype = token_emb_table.dtype
    out_dtype = jnp.dtype(tbl_dtype if out_dtype is None else out_dtype)
    itemsize = jnp.dtype(tbl_dtype).itemsize
    out_itemsize = out_dtype.itemsize

    # Positional slice (plain JAX glue; matches pos_emb[:, :X.shape[1], :]).
    pos_slice = pos_emb[:, :S, :].astype(tbl_dtype)

    # Lane-dense output: pad d_model up to a multiple of 128 if needed so the
    # final store is an unmasked vst (largest single store-path lever).
    D_pad = ((D + 127) // 128) * 128
    if D_pad != D:
        token_emb_table = jnp.pad(token_emb_table, ((0, 0), (0, D_pad - D)))
        pos_slice = jnp.pad(pos_slice, ((0, 0), (0, 0), (0, D_pad - D)))
    Dk = D_pad

    tS = _choose_seq_tile(S, Dk, itemsize)
    assert S % tS == 0, (S, tS)
    # Seq-tile axis first (megacore shards it even when B == 1); batch axis
    # inner so the pos block index (0, si, 0) is constant across it and Pallas
    # skips its re-DMA -> pos_emb is read from HBM once per seq tile, not B x.
    grid = (S // tS, B)

    pos_tile_bytes = tS * Dk * itemsize
    out_tile_bytes = tS * Dk * out_itemsize
    table_bytes = V * Dk * itemsize
    pipeline_bytes = 2 * (pos_tile_bytes + out_tile_bytes)   # double-buffered blocks
    vmem_cap = _vmem_capacity_bytes()

    # Resident-table fast path: generation-aware (64 MiB/TC on v7x vs 128 MiB
    # on v5e/v6e). Budget 2x table (worst-case double buffering) + pipeline.
    resident = (not force_gather) and (
        2 * table_bytes + pipeline_bytes + (4 << 20) <= int(0.65 * vmem_cap))

    ids_flat = token_ids.reshape(B * S).astype(jnp.int32)
    ids_spec = pl.BlockSpec(memory_space=pltpu.MemorySpace.SMEM)  # flat ids in SMEM
    pos_spec = pl.BlockSpec((1, tS, Dk), lambda si, b: (0, si, 0))
    out_spec = pl.BlockSpec((1, tS, Dk), lambda si, b: (b, si, 0))

    if resident:
        kernel = functools.partial(_resident_kernel, S)
        table_spec = pl.BlockSpec((V, Dk), lambda si, b: (0, 0))  # whole table, VMEM
        scratch = []
        table_read_bytes = table_bytes
        vmem_needed = 2 * table_bytes + pipeline_bytes
    else:
        n_sem = min(tS, _NSEM)
        table_spec = pl.BlockSpec(memory_space=pl.ANY)            # table stays in HBM
        table_read_bytes = B * S * Dk * itemsize
        if out_dtype == tbl_dtype:
            # DMA rows straight into the output block: no (tS, D) scratch
            # (saves VMEM, matters most on v7x's 64 MiB/TC).
            kernel = functools.partial(_gather_kernel_direct, S)
            scratch = [pltpu.SemaphoreType.DMA((n_sem,))]
            vmem_needed = pipeline_bytes
        else:
            kernel = functools.partial(_gather_kernel_scratch, S)
            scratch = [pltpu.VMEM((tS, Dk), tbl_dtype),
                       pltpu.SemaphoreType.DMA((n_sem,))]
            vmem_needed = pipeline_bytes + pos_tile_bytes

    vmem_limit = int(min(max(vmem_needed + (8 << 20), 32 << 20), vmem_cap))

    cost = pl.CostEstimate(
        flops=B * S * Dk,
        transcendentals=0,
        bytes_accessed=int(B * S * 4 + S * Dk * itemsize + table_read_bytes
                           + B * S * Dk * out_itemsize))

    out = pl.pallas_call(
        kernel,
        out_shape=jax.ShapeDtypeStruct((B, S, Dk), out_dtype),
        grid=grid,
        in_specs=[ids_spec, table_spec, pos_spec],
        out_specs=out_spec,
        scratch_shapes=scratch,
        compiler_params=pltpu.CompilerParams(
            dimension_semantics=("parallel", "parallel"),
            vmem_limit_bytes=vmem_limit),
        cost_estimate=cost,
    )(ids_flat, token_emb_table, pos_slice)

    if D_pad != D:
        out = out[..., :D]
    return out


if __name__ == "__main__":
    # Small, module-consistent shapes.
    vocab_size = 64
    d_model = 128
    max_seq_len = 16
    batch = 2
    seq = 8

    key = jax.random.PRNGKey(0)
    k_ids, k_tab, k_pos = jax.random.split(key, 3)

    token_ids = jax.random.randint(k_ids, (batch, seq), 0, vocab_size,
                                   dtype=jnp.int32)
    # nn.Embedding default init ~ N(0, 1)
    token_emb_table = jax.random.normal(k_tab, (vocab_size, d_model),
                                        dtype=jnp.float32)
    # Module zero-inits pos_emb; use small random values so the positional-add
    # path is exercised numerically.
    pos_emb = 0.02 * jax.random.normal(k_pos, (1, max_seq_len, d_model),
                                       dtype=jnp.float32)

    # Pure-JAX reference of the eval forward.
    ref = token_emb_table[token_ids] + pos_emb[:, :seq, :]

    # Resident-table fast path (small vocab -> table lives in VMEM).
    out_resident = jax.block_until_ready(
        embedding_semantic_norm_fwd(token_ids, token_emb_table, pos_emb))
    # HBM row-gather path (what a large vocabulary would use).
    out_gather = jax.block_until_ready(
        embedding_semantic_norm_fwd(token_ids, token_emb_table, pos_emb,
                                    force_gather=True))

    assert out_resident.shape == (batch, seq, d_model), out_resident.shape
    assert jnp.allclose(out_resident, ref, atol=1e-6, rtol=1e-6), "resident path mismatch"
    assert jnp.allclose(out_gather, ref, atol=1e-6, rtol=1e-6), "gather path mismatch"
    print("KERNEL_OK")
</pallas_src>

<mosaic_0001>
module attributes {stable_mosaic.version = 11 : i64} {
  func.func @_resident_kernel(%arg0: i32, %arg1: i32, %arg2: memref<16xi32, #tpu.memory_space<smem>>, %arg3: memref<64x128xf32, #tpu.memory_space<vmem>>, %arg4: memref<1x8x128xf32, #tpu.memory_space<vmem>>, %arg5: memref<1x8x128xf32, #tpu.memory_space<vmem>>) attributes {dimension_semantics = [#tpu.dimension_semantics<parallel>, #tpu.dimension_semantics<parallel>], iteration_bounds = array<i64: 1, 2>, scalar_prefetch = 0 : i64, scratch_operands = 0 : i64, tpu.core_type = #tpu.core_type<tc>, window_params = [{transform_indices = @transform_0, window_bounds = array<i64: 16>}, {pipeline_mode = #tpu.pipeline_mode<synchronous>, transform_indices = @transform_1, window_bounds = array<i64: 64, 128>}, {transform_indices = @transform_2, window_bounds = array<i64: 1, 8, 128>}, {transform_indices = @transform_3, window_bounds = array<i64: 1, 8, 128>}]} {
    %c8_i32 = arith.constant 8 : i32
    %0 = arith.muli %arg1, %c8_i32 : i32
    %c8_i32_0 = arith.constant 8 : i32
    %1 = arith.muli %arg0, %c8_i32_0 : i32
    %2 = arith.addi %0, %1 : i32
    %c0_i32 = arith.constant 0 : i32
    %3 = arith.addi %2, %c0_i32 : i32
    %4 = arith.index_cast %3 : i32 to index
    %5 = memref.load %arg2[%4] : memref<16xi32, #tpu.memory_space<smem>>
    %6 = arith.index_cast %5 : i32 to index
    %c0 = arith.constant 0 : index
    %7 = vector.load %arg3[%6, %c0] : memref<64x128xf32, #tpu.memory_space<vmem>>, vector<1x128xf32>
    %c0_1 = arith.constant 0 : index
    %c0_2 = arith.constant 0 : index
    %c0_3 = arith.constant 0 : index
    %8 = vector.load %arg4[%c0_1, %c0_2, %c0_3] : memref<1x8x128xf32, #tpu.memory_space<vmem>>, vector<1x1x128xf32>
    %9 = vector.shape_cast %8 : vector<1x1x128xf32> to vector<1x128xf32>
    %10 = arith.addf %7, %9 : vector<1x128xf32>
    %c0_4 = arith.constant 0 : index
    %c0_5 = arith.constant 0 : index
    %c0_6 = arith.constant 0 : index
    %11 = vector.load %arg5[%c0_4, %c0_5, %c0_6] : memref<1x8x128xf32, #tpu.memory_space<vmem>>, vector<1x1x128xf32>
    %12 = vector.shape_cast %11 : vector<1x1x128xf32> to vector<1x128xf32>
    %13 = vector.shape_cast %10 : vector<1x128xf32> to vector<1x1x128xf32>
    tpu.vector_store %arg5[%c0_4, %c0_5, %c0_6], %13 {strides = array<i32>} : memref<1x8x128xf32, #tpu.memory_space<vmem>>, vector<1x1x128xf32>,
    %c1_i32 = arith.constant 1 : i32
    %14 = arith.addi %2, %c1_i32 : i32
    %15 = arith.index_cast %14 : i32 to index
    %16 = memref.load %arg2[%15] : memref<16xi32, #tpu.memory_space<smem>>
    %17 = arith.index_cast %16 : i32 to index
    %c0_7 = arith.constant 0 : index
    %18 = vector.load %arg3[%17, %c0_7] : memref<64x128xf32, #tpu.memory_space<vmem>>, vector<1x128xf32>
    %c0_8 = arith.constant 0 : index
    %c1 = arith.constant 1 : index
    %c0_9 = arith.constant 0 : index
    %19 = vector.load %arg4[%c0_8, %c1, %c0_9] : memref<1x8x128xf32, #tpu.memory_space<vmem>>, vector<1x1x128xf32>
    %20 = vector.shape_cast %19 : vector<1x1x128xf32> to vector<1x128xf32>
    %21 = arith.addf %18, %20 : vector<1x128xf32>
    %c0_10 = arith.constant 0 : index
    %c1_11 = arith.constant 1 : index
    %c0_12 = arith.constant 0 : index
    %22 = vector.load %arg5[%c0_10, %c1_11, %c0_12] : memref<1x8x128xf32, #tpu.memory_space<vmem>>, vector<1x1x128xf32>
    %23 = vector.shape_cast %22 : vector<1x1x128xf32> to vector<1x128xf32>
    %24 = vector.shape_cast %21 : vector<1x128xf32> to vector<1x1x128xf32>
    tpu.vector_store %arg5[%c0_10, %c1_11, %c0_12], %24 {strides = array<i32>} : memref<1x8x128xf32, #tpu.memory_space<vmem>>, vector<1x1x128xf32>,
    %c2_i32 = arith.constant 2 : i32
    %25 = arith.addi %2, %c2_i32 : i32
    %26 = arith.index_cast %25 : i32 to index
    %27 = memref.load %arg2[%26] : memref<16xi32, #tpu.memory_space<smem>>
    %28 = arith.index_cast %27 : i32 to index
    %c0_13 = arith.constant 0 : index
    %29 = vector.load %arg3[%28, %c0_13] : memref<64x128xf32, #tpu.memory_space<vmem>>, vector<1x128xf32>
    %c0_14 = arith.constant 0 : index
    %c2 = arith.constant 2 : index
    %c0_15 = arith.constant 0 : index
    %30 = vector.load %arg4[%c0_14, %c2, %c0_15] : memref<1x8x128xf32, #tpu.memory_space<vmem>>, vector<1x1x128xf32>
    %31 = vector.shape_cast %30 : vector<1x1x128xf32> to vector<1x128xf32>
    %32 = arith.addf %29, %31 : vector<1x128xf32>
    %c0_16 = arith.constant 0 : index
    %c2_17 = arith.constant 2 : index
    %c0_18 = arith.constant 0 : index
    %33 = vector.load %arg5[%c0_16, %c2_17, %c0_18] : memref<1x8x128xf32, #tpu.memory_space<vmem>>, vector<1x1x128xf32>
    %34 = vector.shape_cast %33 : vector<1x1x128xf32> to vector<1x128xf32>
    %35 = vector.shape_cast %32 : vector<1x128xf32> to vector<1x1x128xf32>
    tpu.vector_store %arg5[%c0_16, %c2_17, %c0_18], %35 {strides = array<i32>} : memref<1x8x128xf32, #tpu.memory_space<vmem>>, vector<1x1x128xf32>,
    %c3_i32 = arith.constant 3 : i32
    %36 = arith.addi %2, %c3_i32 : i32
    %37 = arith.index_cast %36 : i32 to index
    %38 = memref.load %arg2[%37] : memref<16xi32, #tpu.memory_space<smem>>
    %39 = arith.index_cast %38 : i32 to index
    %c0_19 = arith.constant 0 : index
    %40 = vector.load %arg3[%39, %c0_19] : memref<64x128xf32, #tpu.memory_space<vmem>>, vector<1x128xf32>
    %c0_20 = arith.constant 0 : index
    %c3 = arith.constant 3 : index
    %c0_21 = arith.constant 0 : index
    %41 = vector.load %arg4[%c0_20, %c3, %c0_21] : memref<1x8x128xf32, #tpu.memory_space<vmem>>, vector<1x1x128xf32>
    %42 = vector.shape_cast %41 : vector<1x1x128xf32> to vector<1x128xf32>
    %43 = arith.addf %40, %42 : vector<1x128xf32>
    %c0_22 = arith.constant 0 : index
    %c3_23 = arith.constant 3 : index
    %c0_24 = arith.constant 0 : index
    %44 = vector.load %arg5[%c0_22, %c3_23, %c0_24] : memref<1x8x128xf32, #tpu.memory_space<vmem>>, vector<1x1x128xf32>
    %45 = vector.shape_cast %44 : vector<1x1x128xf32> to vector<1x128xf32>
    %46 = vector.shape_cast %43 : vector<1x128xf32> to vector<1x1x128xf32>
    tpu.vector_store %arg5[%c0_22, %c3_23, %c0_24], %46 {strides = array<i32>} : memref<1x8x128xf32, #tpu.memory_space<vmem>>, vector<1x1x128xf32>,
    %c4_i32 = arith.constant 4 : i32
    %47 = arith.addi %2, %c4_i32 : i32
    %48 = arith.index_cast %47 : i32 to index
    %49 = memref.load %arg2[%48] : memref<16xi32, #tpu.memory_space<smem>>
    %50 = arith.index_cast %49 : i32 to index
    %c0_25 = arith.constant 0 : index
    %51 = vector.load %arg3[%50, %c0_25] : memref<64x128xf32, #tpu.memory_space<vmem>>, vector<1x128xf32>
    %c0_26 = arith.constant 0 : index
    %c4 = arith.constant 4 : index
    %c0_27 = arith.constant 0 : index
    %52 = vector.load %arg4[%c0_26, %c4, %c0_27] : memref<1x8x128xf32, #tpu.memory_space<vmem>>, vector<1x1x128xf32>
    %53 = vector.shape_cast %52 : vector<1x1x128xf32> to vector<1x128xf32>
    %54 = arith.addf %51, %53 : vector<1x128xf32>
    %c0_28 = arith.constant 0 : index
    %c4_29 = arith.constant 4 : index
    %c0_30 = arith.constant 0 : index
    %55 = vector.load %arg5[%c0_28, %c4_29, %c0_30] : memref<1x8x128xf32, #tpu.memory_space<vmem>>, vector<1x1x128xf32>
    %56 = vector.shape_cast %55 : vector<1x1x128xf32> to vector<1x128xf32>
    %57 = vector.shape_cast %54 : vector<1x128xf32> to vector<1x1x128xf32>
    tpu.vector_store %arg5[%c0_28, %c4_29, %c0_30], %57 {strides = array<i32>} : memref<1x8x128xf32, #tpu.memory_space<vmem>>, vector<1x1x128xf32>,
    %c5_i32 = arith.constant 5 : i32
    %58 = arith.addi %2, %c5_i32 : i32
    %59 = arith.index_cast %58 : i32 to index
    %60 = memref.load %arg2[%59] : memref<16xi32, #tpu.memory_space<smem>>
    %61 = arith.index_cast %60 : i32 to index
    %c0_31 = arith.constant 0 : index
    %62 = vector.load %arg3[%61, %c0_31] : memref<64x128xf32, #tpu.memory_space<vmem>>, vector<1x128xf32>
    %c0_32 = arith.constant 0 : index
    %c5 = arith.constant 5 : index
    %c0_33 = arith.constant 0 : index
    %63 = vector.load %arg4[%c0_32, %c5, %c0_33] : memref<1x8x128xf32, #tpu.memory_space<vmem>>, vector<1x1x128xf32>
    %64 = vector.shape_cast %63 : vector<1x1x128xf32> to vector<1x128xf32>
    %65 = arith.addf %62, %64 : vector<1x128xf32>
    %c0_34 = arith.constant 0 : index
    %c5_35 = arith.constant 5 : index
    %c0_36 = arith.constant 0 : index
    %66 = vector.load %arg5[%c0_34, %c5_35, %c0_36] : memref<1x8x128xf32, #tpu.memory_space<vmem>>, vector<1x1x128xf32>
    %67 = vector.shape_cast %66 : vector<1x1x128xf32> to vector<1x128xf32>
    %68 = vector.shape_cast %65 : vector<1x128xf32> to vector<1x1x128xf32>
    tpu.vector_store %arg5[%c0_34, %c5_35, %c0_36], %68 {strides = array<i32>} : memref<1x8x128xf32, #tpu.memory_space<vmem>>, vector<1x1x128xf32>,
    %c6_i32 = arith.constant 6 : i32
    %69 = arith.addi %2, %c6_i32 : i32
    %70 = arith.index_cast %69 : i32 to index
    %71 = memref.load %arg2[%70] : memref<16xi32, #tpu.memory_space<smem>>
    %72 = arith.index_cast %71 : i32 to index
    %c0_37 = arith.constant 0 : index
    %73 = vector.load %arg3[%72, %c0_37] : memref<64x128xf32, #tpu.memory_space<vmem>>, vector<1x128xf32>
    %c0_38 = arith.constant 0 : index
    %c6 = arith.constant 6 : index
    %c0_39 = arith.constant 0 : index
    %74 = vector.load %arg4[%c0_38, %c6, %c0_39] : memref<1x8x128xf32, #tpu.memory_space<vmem>>, vector<1x1x128xf32>
    %75 = vector.shape_cast %74 : vector<1x1x128xf32> to vector<1x128xf32>
    %76 = arith.addf %73, %75 : vector<1x128xf32>
    %c0_40 = arith.constant 0 : index
    %c6_41 = arith.constant 6 : index
    %c0_42 = arith.constant 0 : index
    %77 = vector.load %arg5[%c0_40, %c6_41, %c0_42] : memref<1x8x128xf32, #tpu.memory_space<vmem>>, vector<1x1x128xf32>
    %78 = vector.shape_cast %77 : vector<1x1x128xf32> to vector<1x128xf32>
    %79 = vector.shape_cast %76 : vector<1x128xf32> to vector<1x1x128xf32>
    tpu.vector_store %arg5[%c0_40, %c6_41, %c0_42], %79 {strides = array<i32>} : memref<1x8x128xf32, #tpu.memory_space<vmem>>, vector<1x1x128xf32>,
    %c7_i32 = arith.constant 7 : i32
    %80 = arith.addi %2, %c7_i32 : i32
    %81 = arith.index_cast %80 : i32 to index
    %82 = memref.load %arg2[%81] : memref<16xi32, #tpu.memory_space<smem>>
    %83 = arith.index_cast %82 : i32 to index
    %c0_43 = arith.constant 0 : index
    %84 = vector.load %arg3[%83, %c0_43] : memref<64x128xf32, #tpu.memory_space<vmem>>, vector<1x128xf32>
    %c0_44 = arith.constant 0 : index
    %c7 = arith.constant 7 : index
    %c0_45 = arith.constant 0 : index
    %85 = vector.load %arg4[%c0_44, %c7, %c0_45] : memref<1x8x128xf32, #tpu.memory_space<vmem>>, vector<1x1x128xf32>
    %86 = vector.shape_cast %85 : vector<1x1x128xf32> to vector<1x128xf32>
    %87 = arith.addf %84, %86 : vector<1x128xf32>
    %c0_46 = arith.constant 0 : index
    %c7_47 = arith.constant 7 : index
    %c0_48 = arith.constant 0 : index
    %88 = vector.load %arg5[%c0_46, %c7_47, %c0_48] : memref<1x8x128xf32, #tpu.memory_space<vmem>>, vector<1x1x128xf32>
    %89 = vector.shape_cast %88 : vector<1x1x128xf32> to vector<1x128xf32>
    %90 = vector.shape_cast %87 : vector<1x128xf32> to vector<1x1x128xf32>
    tpu.vector_store %arg5[%c0_46, %c7_47, %c0_48], %90 {strides = array<i32>} : memref<1x8x128xf32, #tpu.memory_space<vmem>>, vector<1x1x128xf32>,
    return
  }
  func.func @transform_0(%arg0: i32, %arg1: i32) -> i32 {
    %c0_i32 = arith.constant 0 : i32
    %c0_i32_0 = arith.constant 0 : i32
    return %c0_i32 : i32
  }
  func.func @transform_1(%arg0: i32, %arg1: i32) -> (i32, i32) {
    %c0_i32 = arith.constant 0 : i32
    %c0_i32_0 = arith.constant 0 : i32
    %c0_i32_1 = arith.constant 0 : i32
    return %c0_i32, %c0_i32_0 : i32, i32
  }
  func.func @transform_2(%arg0: i32, %arg1: i32) -> (i32, i32, i32) {
    %c0_i32 = arith.constant 0 : i32
    %c0_i32_0 = arith.constant 0 : i32
    %c0_i32_1 = arith.constant 0 : i32
    return %c0_i32, %arg0, %c0_i32_0 : i32, i32, i32
  }
  func.func @transform_3(%arg0: i32, %arg1: i32) -> (i32, i32, i32) {
    %c0_i32 = arith.constant 0 : i32
    %c0_i32_0 = arith.constant 0 : i32
    return %arg1, %arg0, %c0_i32 : i32, i32, i32
  }
}

</mosaic_0001>

<bundles_post_ra>
// kernel: tpu_custom_call.1
= control target key start
LH: loop header
LB: loop body
LE: loop exit
PB: predicated region body
PF: predicated region fallthrough
CT: control target
= control target key end

     0   :  { %8 = vsyncpa [#allocation5], 0  ;;  %s911_s0 = inlined_call_operand.hbm [shape: s32[16], index: 0, kind: input, shape index: {}]   ;;  %s912_s1 = inlined_call_operand.hbm [shape: f32[64,128], index: 1, kind: input, shape index: {}]   ;;  %s913_s2 = inlined_call_operand.hbm [shape: f32[1,8,128], index: 2, kind: input, shape index: {}]   ;;  %s914_s3 = inlined_call_operand.hbm [shape: f32[2,8,128], index: 3, kind: output, shape index: {}]  }
   0x1   :  { %9 = vsyncpa [#allocation3], 0 }
   0x2   :  { %10 = vsyncpa [#allocation8], 0 }
   0x3   :  { %11 = vsyncpa [#allocation4], 0 }
   0x4   :  { %13 = vsyncpa [#allocation4 + $0x1], 0  ;;  %s674_s12 = smov 0   ;;  %s676_s13 = smov 0  }
   0x5   :  { %s678_s14 = smov 0   ;;  %s680_s15 = smov 0  }
   0x6   :  { %s682_s16 = smov 0   ;;  %s684_s17 = smov 0  }
   0x7 LB: > { %s383_s18 = sadd.s32 4294967295, %s646_s17   ;;  %s384_s19 = sadd.s32 4294967294, %s646_s17   ;;  %s646_s17 = sphi %s684_s17, %s19_s17   ;;  %s642_s16 = sphi %s682_s16, %s935_s16   ;;  %s638_s15 = sphi %s680_s15, %s934_s15   ;;  %s634_s14 = sphi %s678_s14, %s933_s14   ;;  %s630_s13 = sphi %s676_s13, %s932_s13   ;;  %s626_s12 = sphi %s674_s12, %s931_s12  }
   0x8   : > { %s28_s20 = sadd.s32 1, %s642_s16  ;;  %s108_s21 = sadd.s32 1, %s634_s14 }
   0x9   : > { %p29_p0 = scmp.ge.s32.totalorder %s28_s20, 2  ;;  %p118_p1 = scmp.ne.s32.totalorder %s634_s14, %s630_s13 }
   0xa   : > { %p119_p2 = scmp.eq.s32.totalorder %s383_s18, 1  ;;  %p124_p3 = scmp.ne.s32.totalorder %s630_s13, %s626_s12 }
   0xb   : > { %s937_s20 = smov (%p29_p0, %s28_s20), 0  ;;  %p125_p5 = scmp.eq.s32.totalorder %s384_s19, 1 }
   0xc   : > { %p714_p4 = por %p119_p2, %p118_p1  ;;  %s103_s23 = ssub.s32 %s642_s16, %s937_s20 }
   0xd   : > { %p385_p6 = scmp.ge.s32.totalorder %s646_s17, 1  ;;  %p106_p7 = scmp.eq.s32.totalorder %s103_s23, 0 }
   0xe   : > { %s920_s22 = scalar_select %p714_p4, 1, 0 }
   0xf   : > { %p721_p8 = por %p125_p5, %p124_p3  ;;  %p132_p9 = scmp.lt.s32.totalorder %s646_s17, 3 }
  0x10   : > { %s727_s25 = scalar_select %p106_p7, %s634_s14, %s108_s21  }
  0x11   : > { %s921_s24 = scalar_select %p721_p8, 1, 0 }
  0x12   : > { %p729_p10 = pnand %p385_p6, %p132_p9  ;;  %p733_p11 = scmp.eq.s32.totalorder %s383_s18, 0 }
  0x13   : > { %s648_s28 = smov [#allocation6]   ;;  %s649_s4 = smov [#allocation7]  }
  0x14   : > { %s922_s26 = scalar_select %p729_p10, 1, 0 }
  0x15   : > { %s923_s27 = scalar_select %p733_p11, 1, 0 }
  0x16   : > { %p413_p12 = pneg %p729_p10  ;;  %s153_s29 = sshll.u32 %s648_s28, 4  ;;  %s739_s29 = int_to_ptr.vmem [resolvable:$true] %s153_s29 }
  0x17   : > { %s747_s5 = sshll.u32 %s649_s4, 4  ;;  %s487_s8 = scalar_lea.hbm %s911_s0, 16  ;;  %s170_s5 = int_to_ptr.vmem [resolvable:$true] %s747_s5 }
  0x18   : > { %p743_p13 = pnand %p733_p11, %p413_p12  ;;  %p488_p0 = scmp.ne.s32.totalorder %s911_s0, %s487_s8 }
  0x19   : > { %p494_p5 = scmp.lt.u32.totalorder %s487_s8, %s911_s0 }
  0x1a   : > { %p757_p1 = pneg %p743_p13 }
  0x1c   : > { %p490_p2 = pnand %p757_p1, %p488_p0 }
  0x1e   : > { %p491_p3 = pneg %p490_p2 }
  0x20   : > { %p496_p6 = pnand %p494_p5, %p491_p3 }
  0x22   : > { %499 = shalt.err (!%p496_p6)
}
  0x23   : > { %s650_s21 = smov [#allocation2]   ;;  %s500_s7 = scalar_lea.hbm %s912_s1, 1024 }
  0x24   : > { %416 = dma.hbm_to_smem (!%p743_p13), %s911_s0, 16, %s650_s21, [#allocation5]  }
  0x25   : > { %p501_p7 = scmp.ne.s32.totalorder %s912_s1, %s500_s7  ;;  %p507_p0 = scmp.lt.u32.totalorder %s500_s7, %s912_s1 }
  0x27   : > { %p503_p9 = pnand %p501_p7, %p757_p1 }
  0x29   : > { %p504_p12 = pneg %p503_p9 }
  0x2b   : > { %p509_p2 = pnand %p507_p0, %p504_p12 }
  0x2d   : > { %512 = shalt.err (!%p509_p2)
}
  0x2e   : > { %s513_s19 = scalar_lea.vmem %s739_s29, 1024  ;;  %p521_p8 = scmp.lt.s32.totalorder %s739_s29, %s739_s29 }
  0x2f   : > { %p514_p3 = scmp.ne.s32.totalorder %s739_s29, %s513_s19  ;;  %p522_p4 = scmp.lt.s32.totalorder %s513_s19, %s513_s19 }
  0x31   : > { %p516_p5 = pnand %p514_p3, %p757_p1  ;;  %p523_p7 = por %p522_p4, %p521_p8 }
  0x33   : > { %p517_p6 = pneg %p516_p5 }
  0x35   : > { %p524_p9 = pnand %p523_p7, %p517_p6 }
  0x37   : > { %527 = shalt.err (!%p524_p9)
}
  0x38   : > { %s651_s21 = smov 128   ;;  %s652_s23 = smov 8  }
  0x39   : > { %419 = dma.hbm_to_vmem [thread:$0]  (!%p743_p13), %s912_s1, 1024, %s739_s29, [#allocation3], %s651_s21, %s651_s21, %s652_s23  }
  0x3a   : > { %s528_s9 = scalar_lea.hbm %s913_s2, 128 }
  0x3b   : > { %p529_p4 = scmp.ne.s32.totalorder %s913_s2, %s528_s9  ;;  %p535_p0 = scmp.lt.u32.totalorder %s528_s9, %s913_s2 }
  0x3d   : > { %p531_p8 = pnand %p529_p4, %p757_p1 }
  0x3f   : > { %p532_p12 = pneg %p531_p8 }
  0x41   : > { %p537_p2 = pnand %p535_p0, %p532_p12 }
  0x43   : > { %540 = shalt.err (!%p537_p2)
}
  0x44   : > { %s541_s28 = scalar_lea.vmem %s170_s5, 128  ;;  %p549_p7 = scmp.lt.s32.totalorder %s170_s5, %s170_s5 }
  0x45   : > { %p542_p3 = scmp.ne.s32.totalorder %s170_s5, %s541_s28  ;;  %p550_p9 = scmp.lt.s32.totalorder %s541_s28, %s541_s28 }
  0x47   : > { %p544_p5 = pnand %p542_p3, %p757_p1  ;;  %p551_p11 = por %p550_p9, %p549_p7 }
  0x49   : > { %p545_p6 = pneg %p544_p5 }
  0x4b   : > { %p552_p10 = pnand %p551_p11, %p545_p6 }
  0x4d   : > { %555 = shalt.err (!%p552_p10)
}
  0x4e   : > { %422 = dma.hbm_to_vmem [thread:$0]  (!%p743_p13), %s913_s2, 128, %s170_s5, [#allocation8]  }
  0x4f   : > { %p926_p4 = scmp.ne.s32.totalorder %s922_s26, 0 }
  0x50   : > { %p927_p8 = scmp.ne.s32.totalorder (!%p926_p4), %s923_s27, 0 }
  0x51   : > { %182 = sbr.rel (%p926_p4) target bundleno = 134 (0x86), region = 32 }
  0x58   : > { %609 = dma.done.wait (%p927_p8), [#allocation5], 16  }
  0x59   : > { %611 = vsyncadd (%p927_p8), [#allocation5], 4294967280 }
  0x5a   : > { %613 = dma.done.wait (%p927_p8), [#allocation3], 1024  }
  0x5b   : > { %615 = vsyncadd (%p927_p8), [#allocation3], 4294966272 }
  0x5c   : > { %617 = dma.done.wait (%p927_p8), [#allocation8], 128  }
  0x5d   : > { %619 = vsyncadd (%p927_p8), [#allocation8], 4294967168 }
  0x5e   : > { %196 = sfence }
  0x5f   : > { %s919_s26 = sand.u32 1, %s630_s13   ;;  %s829_s30 = sshll.u32 %s638_s15, 3  ;;  %v216_v0 = vld [vmem:[#allocation7] sm:$0x1]  ;;  %v223_v3 = vld [vmem:[#allocation7 + $0x1] sm:$0x1] }
  0x60   : > { %s393_s5 = sshll.u32 %s919_s26, 3  ;;  %s213_s11 = sld [smem:[#allocation2 + %s829_s30]]  ;;  %v230_v4 = vld [vmem:[#allocation7 + $0x2] sm:$0x1]  ;;  %v237_v5 = vld [vmem:[#allocation7 + $0x3] sm:$0x1] }
  0x61   : > { %s219_s23 = sadd.s32 1, %s829_s30  ;;  %s226_s27 = sadd.s32 2, %s829_s30  ;;  %v244_v6 = vld [vmem:[#allocation7 + $0x4] sm:$0x1]  ;;  %v251_v13 = vld [vmem:[#allocation7 + $0x5] sm:$0x1] }
  0x62   : > { %s220_s4 = sld [smem:[#allocation2 + %s219_s23]]  ;;  %s233_s7 = sadd.s32 3, %s829_s30  ;;  %v258_v16 = vld [vmem:[#allocation7 + $0x6] sm:$0x1]  ;;  %v265_v20 = vld [vmem:[#allocation7 + $0x7] sm:$0x1] }
  0x63   : > { %s227_s6 = sld [smem:[#allocation2 + %s226_s27]]  ;;  %s240_s9 = sadd.s32 4, %s829_s30 }
  0x64   : > { %s234_s10 = sld [smem:[#allocation2 + %s233_s7]]  ;;  %s247_s18 = sadd.s32 5, %s829_s30 }
  0x65   : > { %s241_s8 = sld [smem:[#allocation2 + %s240_s9]]  ;;  %s254_s29 = sadd.s32 6, %s829_s30 }
  0x66   : > { %s214_s19 = scalar_lea.vmem [#allocation6], %s213_s11  ;;  %s839_s28 = sld [smem:[#allocation2 + %s247_s18]] }
  0x67   : > { %v215_v1 = vld [vmem:[%s214_s19] sm:$0x1]  ;;  %s842_s21 = sld [smem:[#allocation2 + %s254_s29]]  ;;  %s261_s26 = sadd.s32 7, %s829_s30 }
  0x68   : > { %v217_v2 = vadd.f32 %v216_v0, %v215_v1  ;;  %s845_s23 = scalar_lea.vmem [#allocation9], %s393_s5  ;;  %s221_s27 = scalar_lea.vmem [#allocation6], %s220_s4 }
  0x69   : > { %v222_v7 = vld [vmem:[%s221_s27] sm:$0x1]  ;;  %s228_s11 = scalar_lea.vmem [#allocation6], %s227_s6  ;;  %s262_s7 = sld [smem:[#allocation2 + %s261_s26]] }
  0x6a   : > { %218 = vst [vmem:[%s845_s23] sm:$0x1] %v217_v2  ;;  %v229_v8 = vld [vmem:[%s228_s11] sm:$0x1]  ;;  %v224_v9 = vadd.f32 %v223_v3, %v222_v7  ;;  %s235_s30 = scalar_lea.vmem [#allocation6], %s234_s10  ;;  %s396_s4 = sshll.u32 %s638_s15, 7 }
  0x6b   : > { %v231_v10 = vadd.f32 %v230_v4, %v229_v8  ;;  %v236_v11 = vld [vmem:[%s235_s30] sm:$0x1]  ;;  %s242_s9 = scalar_lea.vmem [#allocation6], %s241_s8  ;;  %s283_s6 = sshll.u32 %s845_s23, 4  ;;  %s863_s6 = int_to_ptr.vmem [resolvable:$true] %s283_s6 }
  0x6c   : > { %v243_v12 = vld [vmem:[%s242_s9] sm:$0x1]  ;;  %225 = vst [vmem:[%s845_s23 + $0x1] sm:$0x1] %v224_v9  ;;  %v238_v14 = vadd.f32 %v237_v5, %v236_v11  ;;  %s249_s5 = scalar_lea.vmem [#allocation6], %s839_s28  ;;  %s861_s19 = scalar_lea.hbm %s914_s3, %s396_s4 }
  0x6d   : > { %232 = vst [vmem:[%s845_s23 + $0x2] sm:$0x1] %v231_v10  ;;  %v245_v15 = vadd.f32 %v244_v6, %v243_v12  ;;  %v250_v17 = vld [vmem:[%s249_s5] sm:$0x1]  ;;  %s256_s26 = scalar_lea.vmem [#allocation6], %s842_s21  ;;  %s928_s28 = sand.u32 1, %s630_s13  }
  0x6e   : > { %239 = vst [vmem:[%s845_s23 + $0x3] sm:$0x1] %v238_v14  ;;  %v252_v18 = vadd.f32 %v251_v13, %v250_v17  ;;  %v257_v19 = vld [vmem:[%s256_s26] sm:$0x1]  ;;  %s269_s15 = scalar_lea.sflag [#allocation4], %s928_s28  ;;  %s556_s29 = scalar_lea.vmem %s863_s6, 128 }
  0x6f   : > { %246 = vst [vmem:[%s845_s23 + $0x4] sm:$0x1] %v245_v15  ;;  %v259_v21 = vadd.f32 %v258_v16, %v257_v19  ;;  %s263_s10 = scalar_lea.vmem [#allocation6], %s262_s7  ;;  %p557_p10 = scmp.ne.s32.totalorder %s863_s6, %s556_s29 }
  0x70   : > { %253 = vst [vmem:[%s845_s23 + $0x5] sm:$0x1] %v252_v18  ;;  %v264_v22 = vld [vmem:[%s263_s10] sm:$0x1]  ;;  %p929_p11 = scmp.ne.s32.totalorder %s920_s22, 0  ;;  %s653_s21 = smov [#allocation9]  }
  0x71   : > { %260 = vst [vmem:[%s845_s23 + $0x6] sm:$0x1] %v259_v21  ;;  %v266_v23 = vadd.f32 %v265_v20, %v264_v22  ;;  %s560_s27 = sshll.u32 %s653_s21, 4  ;;  %s561_s27 = int_to_ptr.vmem [resolvable:$false] %s560_s27 }
  0x72   : > { %p558_p13 = pnand %p557_p10, %p929_p11  ;;  %s562_s11 = scalar_lea.vmem %s561_s27, 256 }
  0x73   : > { %267 = vst [vmem:[%s845_s23 + $0x7] sm:$0x1] %v266_v23  ;;  %p563_p12 = scmp.lt.s32.totalorder %s863_s6, %s561_s27  ;;  %p564_p0 = scmp.lt.s32.totalorder %s562_s11, %s556_s29 }
  0x74   : > { %p559_p1 = pneg %p558_p13 }
  0x75   : > { %p565_p2 = por %p564_p0, %p563_p12 }
  0x77   : > { %p566_p3 = pnand %p565_p2, %p559_p1 }
  0x79   : > { %569 = shalt.err (!%p566_p3)
}
  0x7a   : > { %s570_s23 = scalar_lea.hbm %s861_s19, 128  ;;  %s574_s9 = scalar_lea.hbm %s914_s3, 256 }
  0x7b   : > { %p571_p5 = scmp.ne.s32.totalorder %s861_s19, %s570_s23  ;;  %p575_p9 = scmp.lt.u32.totalorder %s861_s19, %s914_s3 }
  0x7c   : > { %p576_p4 = scmp.lt.u32.totalorder %s574_s9, %s570_s23  ;;  %p578_p10 = scmp.lt.u32.totalorder %s570_s23, %s861_s19 }
  0x7d   : > { %p572_p6 = pnand %p571_p5, %p929_p11 }
  0x7e   : > { %p577_p8 = por %p576_p4, %p575_p9 }
  0x7f   : > { %p573_p7 = pneg %p572_p6 }
  0x80   : > { %p579_p13 = por %p578_p10, %p577_p8 }
  0x82   : > { %p580_p1 = pnand %p579_p13, %p573_p7 }
  0x84   : > { %583 = shalt.err (!%p580_p1)
}
  0x85   : > { %411 = dma.vmem_to_hbm [thread:$0]  (%p929_p11), %s863_s6, 128, %s861_s19, %s269_s15  }
  0x86 PF: > { %p433_p12 = scmp.ge.s32.totalorder %s646_s17, 2  ;;  %s295_s4 = sand.u32 1, %s626_s12  }
  0x87   : > { %p930_p0 = scmp.ne.s32.totalorder %s921_s24, 0  ;;  %s296_s10 = scalar_lea.sflag [#allocation4], %s295_s4 }
  0x89   : > { %p424_p2 = pnand %p433_p12, %p930_p0 }
  0x8b   : > { %621 = dma.done.wait (!%p424_p2), %s296_s10, 128  }
  0x8c   : > { %623 = vsyncadd (!%p424_p2), %s296_s10, 4294967168  ;;  %s19_s17 = sadd.s32 1, %s646_s17   ;;  %s931_s12 = smov %s630_s13 }
  0x8d   : > { %p16_p3 = scmp.ge.s32.totalorder %s19_s17, 4   ;;  %s932_s13 = smov %s634_s14 }
  0x8e   : > { %s933_s14 = smov %s727_s25  ;;  %s934_s15 = smov %s642_s16 }
  0x8f   : > { %s935_s16 = smov %s937_s20  ;;  %18 = sbr.rel (!%p16_p3) target bundleno = 7 (0x7), region = 87 }
  0x96   :  { %301 = vsyncpa [#allocation3], 1 }
  0x97   :  { %303 = vsyncpa [#allocation3 + $0x1], 1 }
  0x98   :  { %304 = vsyncpa [#allocation8], 1 }
  0x99   :  { %305 = vsyncpa [#allocation4], 1 }
  0x9a   :  { %307 = vsyncpa [#allocation4 + $0x1], 1 }
  0x9b   :  { %308 = vsyncpa [#allocation5], 1 }
  0x9c   :  { %310 = vsyncpa [#allocation5 + $0x1], 1 }

</bundles_post_ra>
